<compile_context>
chip_gen: v7x
topology: tpu7x:2x2x1
jax: 0.10.0
libtpu: 0.0.40
codegen_flags: <defaults>
</compile_context>

<pallas_src>
import jax
import jax.numpy as jnp
from jax import lax
from jax.experimental import pallas as pl
from jax.experimental.pallas import tpu as pltpu


def apl_forward(outputs, targets, alpha=0.5, *, max_tile_rows=None):
    """outputs: (N, C) float32/bfloat16 logits, targets: (N,) integer labels.

    Returns (apl_loss, ce, mae) as JAX f32 scalars.
    """
    N, C = outputs.shape
    targets2d = targets.astype(jnp.int32).reshape(N, 1)

    # --- tile sizing: target ~4 MiB logits block (x2 double-buffered) ---------
    if max_tile_rows is None:
        row_bytes = C * jnp.dtype(outputs.dtype).itemsize
        max_tile_rows = (4 * 1024 * 1024) // max(row_bytes, 1)
        max_tile_rows = max(8, min(4096, (max_tile_rows // 8) * 8))
    if N <= max_tile_rows:
        tile_rows = N                      # full-extent block: always layout-legal
    else:
        tile_rows = max(8, (max_tile_rows // 8) * 8)

    total_blocks = (N + tile_rows - 1) // tile_rows
    num_splits = 2 if total_blocks >= 2 else 1          # megacore split (v7x)
    inner_blocks = (total_blocks + num_splits - 1) // num_splits

    def block_index(c, i):
        # Clamp so a fully-out-of-range block (odd total_blocks) re-reads the last
        # valid block; its contribution is masked to zero inside the kernel.
        gb = jnp.minimum(c * inner_blocks + i, total_blocks - 1)
        return (gb, 0)

    def kernel(logits_ref, targets_ref, ce_ref, mae_ref):
        c = pl.program_id(0)
        i = pl.program_id(1)

        @pl.when(i == 0)
        def _init():
            ce_ref[...] = jnp.zeros_like(ce_ref)
            mae_ref[...] = jnp.zeros_like(mae_ref)

        # Row-validity mask (remainder block / clamped extra block).
        gb = c * inner_blocks + i                       # unclamped global block id
        rows = gb * tile_rows + lax.broadcasted_iota(
            jnp.int32, (tile_rows, 1), 0)
        valid = rows < N                                # (T, 1) bool
        valid_f = valid.astype(jnp.float32)

        # Upcast in-kernel (bf16 over the wire, f32 math/accumulation); zero the
        # padded rows BEFORE exp so garbage can't produce inf/nan.
        x = jnp.where(valid, logits_ref[...].astype(jnp.float32), 0.0)  # (T, C)
        tgt = targets_ref[...]                                          # (T, 1) i32

        # Target logit without materializing a float one-hot.
        col = lax.broadcasted_iota(jnp.int32, (tile_rows, C), 1)
        picked = jnp.sum(jnp.where(col == tgt, x, 0.0),
                         axis=1, keepdims=True)                         # (T, 1)

        # Numerically stable log-sum-exp.
        m = jnp.max(x, axis=1, keepdims=True)
        ex = jnp.exp(x - m)
        lse = jnp.log(jnp.sum(ex, axis=1, keepdims=True)) + m           # (T, 1)

        ce_rows = (lse - picked) * valid_f              # -log softmax[target]
        p_t = jnp.exp(picked - lse)                     # softmax prob of the target
        # sum_j |softmax_j - onehot_j| = 2 * (1 - p_target)
        mae_rows = 2.0 * (1.0 - p_t) * valid_f

        # Accumulate raw partial sums (scalar broadcast over the tiny lane block).
        ce_ref[...] += jnp.sum(ce_rows)
        mae_ref[...] += jnp.sum(mae_rows)

    out_part_shape = jax.ShapeDtypeStruct((num_splits, 1, 128), jnp.float32)
    ce_parts, mae_parts = pl.pallas_call(
        kernel,
        out_shape=(out_part_shape, out_part_shape),
        grid=(num_splits, inner_blocks),
        in_specs=[
            pl.BlockSpec((tile_rows, C), block_index),
            pl.BlockSpec((tile_rows, 1), block_index),
        ],
        out_specs=(
            pl.BlockSpec((1, 1, 128), lambda c, i: (c, 0, 0)),
            pl.BlockSpec((1, 1, 128), lambda c, i: (c, 0, 0)),
        ),
        compiler_params=pltpu.CompilerParams(
            dimension_semantics=("parallel", "arbitrary"),
            vmem_limit_bytes=32 * 1024 * 1024,
        ),
    )(outputs, targets2d)

    # Combine per-split partials and apply the true-(N, C) normalization.
    ce = jnp.sum(ce_parts[:, 0, 0]) * (1.0 / N)
    mae = jnp.sum(mae_parts[:, 0, 0]) * (1.0 / (N * C))
    apl_loss = alpha * ce + (1.0 - alpha) * mae
    return apl_loss, ce, mae


def apl_reference(outputs, targets, alpha=0.5):
    """Pure-JAX reference matching F.cross_entropy + MAE(softmax, one_hot)."""
    N, C = outputs.shape
    x = outputs.astype(jnp.float32)
    logp = jax.nn.log_softmax(x, axis=1)
    ce = -jnp.mean(jnp.take_along_axis(logp, targets[:, None], axis=1))
    onehot = jax.nn.one_hot(targets, C, dtype=jnp.float32)
    mae = jnp.mean(jnp.abs(jax.nn.softmax(x, axis=1) - onehot))
    return alpha * ce + (1.0 - alpha) * mae, ce, mae


if __name__ == "__main__":
    key = jax.random.PRNGKey(0)
    k1, k2, k3, k4 = jax.random.split(key, 4)

    # Case 1: small, lane-friendly, single block.
    N1, C1 = 8, 128
    out1 = jax.random.normal(k1, (N1, C1), dtype=jnp.float32)
    tgt1 = jax.random.randint(k2, (N1,), 0, C1, dtype=jnp.int32)
    loss1, ce1, mae1 = apl_forward(out1, tgt1, alpha=0.5)
    jax.block_until_ready(loss1)
    rl1, rc1, rm1 = apl_reference(out1, tgt1, alpha=0.5)
    assert abs(float(loss1) - float(rl1)) < 1e-4, (loss1, rl1)
    assert abs(float(ce1) - float(rc1)) < 1e-4, (ce1, rc1)
    assert abs(float(mae1) - float(rm1)) < 1e-5, (mae1, rm1)

    # Case 2: exercises the row grid, remainder masking and the 2-way split.
    N2, C2 = 300, 128
    out2 = jax.random.normal(k3, (N2, C2), dtype=jnp.float32)
    tgt2 = jax.random.randint(k4, (N2,), 0, C2, dtype=jnp.int32)
    loss2, ce2, mae2 = apl_forward(out2, tgt2, alpha=0.5, max_tile_rows=128)
    jax.block_until_ready(loss2)
    rl2, rc2, rm2 = apl_reference(out2, tgt2, alpha=0.5)
    assert abs(float(loss2) - float(rl2)) < 1e-4, (loss2, rl2)
    assert abs(float(ce2) - float(rc2)) < 1e-4, (ce2, rc2)
    assert abs(float(mae2) - float(rm2)) < 1e-5, (mae2, rm2)

    print("KERNEL_OK")
</pallas_src>

<mosaic_0001>
module attributes {stable_mosaic.version = 11 : i64} {
  func.func @kernel(%arg0: i32, %arg1: i32, %arg2: memref<8x128xf32, #tpu.memory_space<vmem>>, %arg3: memref<8x1xi32, #tpu.memory_space<vmem>>, %arg4: memref<1x1x128xf32, #tpu.memory_space<vmem>>, %arg5: memref<1x1x128xf32, #tpu.memory_space<vmem>>) attributes {dimension_semantics = [#tpu.dimension_semantics<parallel>, #tpu.dimension_semantics<arbitrary>], iteration_bounds = array<i64: 1, 1>, scalar_prefetch = 0 : i64, scratch_operands = 0 : i64, tpu.core_type = #tpu.core_type<tc>, window_params = [{transform_indices = @transform_0, window_bounds = array<i64: 8, 128>}, {transform_indices = @transform_1, window_bounds = array<i64: 8, 1>}, {transform_indices = @transform_2, window_bounds = array<i64: 1, 1, 128>}, {transform_indices = @transform_3, window_bounds = array<i64: 1, 1, 128>}]} {
    %c0_i32 = arith.constant 0 : i32
    %0 = arith.cmpi eq, %arg1, %c0_i32 : i32
    %1 = arith.extui %0 : i1 to i32
    %c0_i32_0 = arith.constant 0 : i32
    %2 = arith.cmpi ne, %1, %c0_i32_0 : i32
    scf.if %2 {
      %cst_25 = arith.constant 0.000000e+00 : f32
      %60 = vector.broadcast %cst_25 : f32 to vector<1x1x128xf32>
      %c0_26 = arith.constant 0 : index
      %c0_27 = arith.constant 0 : index
      %c0_28 = arith.constant 0 : index
      %61 = vector.load %arg4[%c0_26, %c0_27, %c0_28] : memref<1x1x128xf32, #tpu.memory_space<vmem>>, vector<1x1x128xf32>
      tpu.vector_store %arg4[%c0_26, %c0_27, %c0_28], %60 {strides = array<i32>} : memref<1x1x128xf32, #tpu.memory_space<vmem>>, vector<1x1x128xf32>,
      %cst_29 = arith.constant 0.000000e+00 : f32
      %62 = vector.broadcast %cst_29 : f32 to vector<1x1x128xf32>
      %c0_30 = arith.constant 0 : index
      %c0_31 = arith.constant 0 : index
      %c0_32 = arith.constant 0 : index
      %63 = vector.load %arg5[%c0_30, %c0_31, %c0_32] : memref<1x1x128xf32, #tpu.memory_space<vmem>>, vector<1x1x128xf32>
      tpu.vector_store %arg5[%c0_30, %c0_31, %c0_32], %62 {strides = array<i32>} : memref<1x1x128xf32, #tpu.memory_space<vmem>>, vector<1x1x128xf32>,
    } else {
    }
    %c1_i32 = arith.constant 1 : i32
    %3 = arith.muli %arg0, %c1_i32 : i32
    %4 = arith.addi %3, %arg1 : i32
    %c8_i32 = arith.constant 8 : i32
    %5 = arith.muli %4, %c8_i32 : i32
    %6 = tpu.iota {dimensions = array<i32: 0>} : vector<8x1xi32>
    %7 = vector.broadcast %5 : i32 to vector<8x1xi32>
    %8 = arith.addi %7, %6 : vector<8x1xi32>
    %c8_i32_1 = arith.constant 8 : i32
    %9 = vector.broadcast %c8_i32_1 : i32 to vector<8x1xi32>
    %10 = arith.cmpi slt, %8, %9 : vector<8x1xi32>
    %11 = arith.extui %10 : vector<8x1xi1> to vector<8x1xi32>
    %12 = arith.sitofp %11 : vector<8x1xi32> to vector<8x1xf32>
    %c0 = arith.constant 0 : index
    %c0_2 = arith.constant 0 : index
    %13 = vector.load %arg2[%c0, %c0_2] : memref<8x128xf32, #tpu.memory_space<vmem>>, vector<8x128xf32>
    %cst = arith.constant 0.000000e+00 : f32
    %14 = vector.shape_cast %10 : vector<8x1xi1> to vector<8x1xi1>
    %15 = vector.broadcast %14 : vector<8x1xi1> to vector<8x128xi1>
    %16 = vector.broadcast %cst : f32 to vector<8x128xf32>
    %17 = arith.select %15, %13, %16 : vector<8x128xi1>, vector<8x128xf32>
    %c0_3 = arith.constant 0 : index
    %c0_4 = arith.constant 0 : index
    %18 = vector.load %arg3[%c0_3, %c0_4] : memref<8x1xi32, #tpu.memory_space<vmem>>, vector<8x1xi32>
    %19 = tpu.iota {dimensions = array<i32: 1>} : vector<8x128xi32>
    %20 = vector.broadcast %18 : vector<8x1xi32> to vector<8x128xi32>
    %21 = arith.cmpi eq, %19, %20 : vector<8x128xi32>
    %cst_5 = arith.constant 0.000000e+00 : f32
    %22 = vector.broadcast %cst_5 : f32 to vector<8x128xf32>
    %23 = arith.select %21, %17, %22 : vector<8x128xi1>, vector<8x128xf32>
    %cst_6 = arith.constant dense<0.000000e+00> : vector<8xf32>
    %24 = vector.multi_reduction <add>, %23, %cst_6 [1] : vector<8x128xf32> to vector<8xf32>
    %25 = vector.shape_cast %24 : vector<8xf32> to vector<8x1xf32>
    %cst_7 = arith.constant dense<0xFF800000> : vector<8xf32>
    %26 = vector.multi_reduction <maximumf>, %17, %cst_7 [1] : vector<8x128xf32> to vector<8xf32>
    %27 = vector.shape_cast %26 : vector<8xf32> to vector<8x1xf32>
    %28 = vector.broadcast %27 : vector<8x1xf32> to vector<8x128xf32>
    %29 = arith.subf %17, %28 : vector<8x128xf32>
    %30 = math.exp %29 : vector<8x128xf32>
    %cst_8 = arith.constant dense<0.000000e+00> : vector<8xf32>
    %31 = vector.multi_reduction <add>, %30, %cst_8 [1] : vector<8x128xf32> to vector<8xf32>
    %32 = vector.shape_cast %31 : vector<8xf32> to vector<8x1xf32>
    %33 = math.log %32 : vector<8x1xf32>
    %34 = arith.addf %33, %27 : vector<8x1xf32>
    %35 = arith.subf %34, %25 : vector<8x1xf32>
    %36 = arith.mulf %35, %12 : vector<8x1xf32>
    %37 = arith.subf %25, %34 : vector<8x1xf32>
    %38 = math.exp %37 : vector<8x1xf32>
    %cst_9 = arith.constant 1.000000e+00 : f32
    %39 = vector.broadcast %cst_9 : f32 to vector<8x1xf32>
    %40 = arith.subf %39, %38 : vector<8x1xf32>
    %cst_10 = arith.constant 2.000000e+00 : f32
    %41 = vector.broadcast %cst_10 : f32 to vector<8x1xf32>
    %42 = arith.mulf %41, %40 : vector<8x1xf32>
    %43 = arith.mulf %42, %12 : vector<8x1xf32>
    %c0_11 = arith.constant 0 : index
    %c0_12 = arith.constant 0 : index
    %c0_13 = arith.constant 0 : index
    %44 = vector.load %arg4[%c0_11, %c0_12, %c0_13] : memref<1x1x128xf32, #tpu.memory_space<vmem>>, vector<1x1x128xf32>
    %45 = vector.shape_cast %36 : vector<8x1xf32> to vector<1x8x1xf32>
    %cst_14 = arith.constant dense<0.000000e+00> : vector<1xf32>
    %46 = vector.multi_reduction <add>, %45, %cst_14 [1, 2] : vector<1x8x1xf32> to vector<1xf32>
    %47 = vector.shape_cast %46 : vector<1xf32> to vector<1x1x1xf32>
    %48 = vector.extract %47[0, 0, 0] : f32 from vector<1x1x1xf32>
    %49 = vector.broadcast %48 : f32 to vector<1x1x128xf32>
    %50 = arith.addf %44, %49 : vector<1x1x128xf32>
    %c0_15 = arith.constant 0 : index
    %c0_16 = arith.constant 0 : index
    %c0_17 = arith.constant 0 : index
    %51 = vector.load %arg4[%c0_15, %c0_16, %c0_17] : memref<1x1x128xf32, #tpu.memory_space<vmem>>, vector<1x1x128xf32>
    tpu.vector_store %arg4[%c0_15, %c0_16, %c0_17], %50 {strides = array<i32>} : memref<1x1x128xf32, #tpu.memory_space<vmem>>, vector<1x1x128xf32>,
    %c0_18 = arith.constant 0 : index
    %c0_19 = arith.constant 0 : index
    %c0_20 = arith.constant 0 : index
    %52 = vector.load %arg5[%c0_18, %c0_19, %c0_20] : memref<1x1x128xf32, #tpu.memory_space<vmem>>, vector<1x1x128xf32>
    %53 = vector.shape_cast %43 : vector<8x1xf32> to vector<1x8x1xf32>
    %cst_21 = arith.constant dense<0.000000e+00> : vector<1xf32>
    %54 = vector.multi_reduction <add>, %53, %cst_21 [1, 2] : vector<1x8x1xf32> to vector<1xf32>
    %55 = vector.shape_cast %54 : vector<1xf32> to vector<1x1x1xf32>
    %56 = vector.extract %55[0, 0, 0] : f32 from vector<1x1x1xf32>
    %57 = vector.broadcast %56 : f32 to vector<1x1x128xf32>
    %58 = arith.addf %52, %57 : vector<1x1x128xf32>
    %c0_22 = arith.constant 0 : index
    %c0_23 = arith.constant 0 : index
    %c0_24 = arith.constant 0 : index
    %59 = vector.load %arg5[%c0_22, %c0_23, %c0_24] : memref<1x1x128xf32, #tpu.memory_space<vmem>>, vector<1x1x128xf32>
    tpu.vector_store %arg5[%c0_22, %c0_23, %c0_24], %58 {strides = array<i32>} : memref<1x1x128xf32, #tpu.memory_space<vmem>>, vector<1x1x128xf32>,
    return
  }
  func.func @transform_0(%arg0: i32, %arg1: i32) -> (i32, i32) {
    %c1_i32 = arith.constant 1 : i32
    %0 = arith.muli %arg0, %c1_i32 : i32
    %1 = arith.addi %0, %arg1 : i32
    %c0_i32 = arith.constant 0 : i32
    %2 = arith.minsi %1, %c0_i32 : i32
    %c0_i32_0 = arith.constant 0 : i32
    %c0_i32_1 = arith.constant 0 : i32
    return %2, %c0_i32_0 : i32, i32
  }
  func.func @transform_1(%arg0: i32, %arg1: i32) -> (i32, i32) {
    %c1_i32 = arith.constant 1 : i32
    %0 = arith.muli %arg0, %c1_i32 : i32
    %1 = arith.addi %0, %arg1 : i32
    %c0_i32 = arith.constant 0 : i32
    %2 = arith.minsi %1, %c0_i32 : i32
    %c0_i32_0 = arith.constant 0 : i32
    %c0_i32_1 = arith.constant 0 : i32
    return %2, %c0_i32_0 : i32, i32
  }
  func.func @transform_2(%arg0: i32, %arg1: i32) -> (i32, i32, i32) {
    %c0_i32 = arith.constant 0 : i32
    %c0_i32_0 = arith.constant 0 : i32
    %c0_i32_1 = arith.constant 0 : i32
    return %arg0, %c0_i32, %c0_i32_0 : i32, i32, i32
  }
  func.func @transform_3(%arg0: i32, %arg1: i32) -> (i32, i32, i32) {
    %c0_i32 = arith.constant 0 : i32
    %c0_i32_0 = arith.constant 0 : i32
    %c0_i32_1 = arith.constant 0 : i32
    return %arg0, %c0_i32, %c0_i32_0 : i32, i32, i32
  }
}

</mosaic_0001>

<bundles_post_ra>
// kernel: tpu_custom_call.1
= control target key start
LH: loop header
LB: loop body
LE: loop exit
PB: predicated region body
PF: predicated region fallthrough
CT: control target
= control target key end

     0   :  { %9 = vsyncpa [#allocation3], 0  ;;  %s301_s0 = inlined_call_operand.vmem [shape: f32[8,128], index: 0, kind: input, shape index: {}]   ;;  %s302_s1 = inlined_call_operand.vmem [shape: s32[8,1], index: 1, kind: input, shape index: {}]   ;;  %s303_s2 = inlined_call_operand.hbm [shape: f32[1,1,128], index: 2, kind: output, shape index: {0}]   ;;  %s304_s3 = inlined_call_operand.hbm [shape: f32[1,1,128], index: 3, kind: output, shape index: {1}]  }
   0x1   :  { %v84_v0 = vld [vmem:[%s301_s0] sm:$0xff] }
   0x2   :  { %10 = vsyncpa [#allocation5], 0  ;;  %97 = vmax.xlane.f32.xlu0 %v84_v0  ;;  %v247_v1 = vmov 0   ;;  %v87_v2 = vld [vmem:[%s302_s1] sm:$0xff]  ;;  %v88_v6 = vlaneseq  ;;  %vm116_vm1 = vcmask 7168   ;;  %v248_v24 = vmov 0.0  }
   0x3   :  { %192 = vset.pattern.permute.xlu0 %v247_v1  ;;  %73 = vst [vmem:[#allocation2] sm:$0x1] %v248_v24  ;;  %74 = vst [vmem:[#allocation4] sm:$0x1] %v248_v24  ;;  %s249_s0 = smov [#allocation2]  }
   0x4   :  { %v89_v7 = vand.u32 127, %v88_v6  ;;  %s150_s1 = sshll.u32 %s249_s0, 4  ;;  %s151_s1 = int_to_ptr.vmem [resolvable:$true] %s150_s1 }
   0x5   :  { %s199_s17 = scalar_lea.vmem %s151_s1, 16  ;;  %s203_s18 = scalar_lea.vmem %s151_s1, 32 }
   0x6   :  { %p200_p0 = scmp.ne.s32.totalorder %s151_s1, %s199_s17  ;;  %p204_p1 = scmp.lt.s32.totalorder %s151_s1, %s151_s1 }
   0x7   :  { %p205_p2 = scmp.lt.s32.totalorder %s203_s18, %s199_s17 }
   0x9   :  { %p206_p3 = por %p205_p2, %p204_p1 }
   0xa   :  { %v115_v39 = vld [vmem:[#allocation2] sm:$0x1] }
   0xb   :  { %p207_p4 = pnand %p206_p3, %p200_p0 }
  0x18   :  { %91 = vperm.xlu0 %192, %v87_v2  }
  0x8f   :  { %v98_v3 = vpop.xlane.xlu0 %97 }
  0x90   :  { %v99_v4 = vsub.f32 %v84_v0, %v98_v3 }
  0x92   :  { %v100_v5 = vmul.f32 1.442695, %v99_v4 }
  0x94   :  { %193 = vpow2.f32 %v100_v5 }
  0x97   :  { %v92_v8 = vpop.permute.xlu0 %91 }
  0x98   :  { %vm93_vm0 = vcmp.eq.s32.totalorder %v89_v7, %v92_v8 }
  0x99   :  { %v94_v10 = vsel %vm93_vm0, %v84_v0, 0.0 }
  0x9e   :  { %v194_v9 = vpop.eup %193 }
  0x9f   :  { %102 = vadd.xlane.f32.xlu1 %v194_v9 }
  0xa3   :  { %95 = vadd.xlane.f32.xlu1 %v94_v10 }
 0x12c   :  { %v103_v11 = vpop.xlane.xlu1 %102 }
 0x12d   :  { %195 = vlog2.f32 %v103_v11 }
 0x130   :  { %v96_v14 = vpop.xlane.xlu1 %95 }
 0x137   :  { %v196_v12 = vpop.eup %195 }
 0x138   :  { %v105_v13 = vmul.f32 0.6931472, %v196_v12 }
 0x13a   :  { %v106_v15 = vadd.f32 %v105_v13, %v98_v3 }
 0x13c   :  { %v107_v16 = vsub.f32 %v106_v15, %v96_v14  ;;  %v109_v17 = vsub.f32 %v96_v14, %v106_v15 }
 0x13e   :  { %v110_v18 = vmul.f32 1.442695, %v109_v17  ;;  %v117_v19 = vsel %vm116_vm1, %v107_v16, 0.0 }
 0x13f   :  { %118 = vadd.xlane.f32.xlu1 %v117_v19 }
 0x140   :  { %197 = vpow2.f32 %v110_v18 }
 0x14a   :  { %v198_v20 = vpop.eup %197 }
 0x14b   :  { %v112_v21 = vsub.f32 1.0, %v198_v20 }
 0x14d   :  { %v113_v22 = vmul.f32 2.0, %v112_v21 }
 0x14f   :  { %v131_v23 = vsel %vm116_vm1, %v113_v22, 0.0 }
 0x150   :  { %132 = vadd.xlane.f32.xlu1 %v131_v23 }
 0x1cc   :  { %v119_v25 = vpop.xlane.xlu1 %118 }
 0x1cd   :  { %v120_v26 = vrot.slane %v119_v25, 4 }
 0x1cf   :  { %v121_v27 = vadd.f32 %v120_v26, %v119_v25 }
 0x1d1   :  { %v122_v28 = vrot.slane %v121_v27, 2 }
 0x1d3   :  { %v123_v29 = vadd.f32 %v122_v28, %v121_v27 }
 0x1d5   :  { %v124_v30 = vrot.slane %v123_v29, 1 }
 0x1d7   :  { %v125_v31 = vadd.f32 %v124_v30, %v123_v29 }
 0x1d9   :  { %184 = vpush %v125_v31 }
 0x1dd   :  { %v133_v32 = vpop.xlane.xlu1 %132 }
 0x1de   :  { %v134_v33 = vrot.slane %v133_v32, 4 }
 0x1e0   :  { %v135_v34 = vadd.f32 %v134_v33, %v133_v32 }
 0x1e2   :  { %v136_v35 = vrot.slane %v135_v34, 2 }
 0x1e4   :  { %v137_v36 = vadd.f32 %v136_v35, %v135_v34 }
 0x1e6   :  { %v138_v37 = vrot.slane %v137_v36, 1 }
 0x1e8   :  { %v139_v38 = vadd.f32 %v138_v37, %v137_v36 }
 0x1ea   :  { %186 = vpush %v139_v38 }
 0x20a   :  { %s185_s16 = spop %184 }
 0x20b   :  { %v127_v40 = vstv %s185_s16 }
 0x20c   :  { %v128_v41 = vadd.f32 %v127_v40, %v115_v39 }
 0x20e   :  { %129 = vst [vmem:[#allocation2] sm:$0x1] %v128_v41 }
 0x20f   :  { %210 = shalt.err (!%p207_p4)
}
 0x210   :  { %s211_s21 = scalar_lea.hbm %s303_s2, 16 }
 0x211   :  { %p212_p5 = scmp.ne.s32.totalorder %s303_s2, %s211_s21  ;;  %p215_p6 = scmp.lt.u32.totalorder %s211_s21, %s303_s2 }
 0x213   :  { %p217_p7 = pnand %p215_p6, %p212_p5 }
 0x215   :  { %220 = shalt.err (!%p217_p7)
}
 0x216   :  { %153 = dma.vmem_to_hbm [thread:$0]  %s151_s1, 16, %s303_s2, [#allocation3]   ;;  %v130_v42 = vld [vmem:[#allocation4] sm:$0x1] }
 0x217   :  { %s250_s28 = smov [#allocation4]  }
 0x218   :  { %s160_s29 = sshll.u32 %s250_s28, 4  ;;  %s161_s29 = int_to_ptr.vmem [resolvable:$true] %s160_s29 }
 0x219   :  { %s221_s4 = scalar_lea.vmem %s161_s29, 16  ;;  %s225_s5 = scalar_lea.vmem %s161_s29, 32 }
 0x21a   :  { %p222_p8 = scmp.ne.s32.totalorder %s161_s29, %s221_s4  ;;  %p226_p9 = scmp.lt.s32.totalorder %s161_s29, %s161_s29 }
 0x21b   :  { %s187_s30 = spop %186  ;;  %p227_p10 = scmp.lt.s32.totalorder %s225_s5, %s221_s4 }
 0x21c   :  { %v141_v43 = vstv %s187_s30 }
 0x21d   :  { %v142_v44 = vadd.f32 %v141_v43, %v130_v42  ;;  %p228_p11 = por %p227_p10, %p226_p9 }
 0x21f   :  { %143 = vst [vmem:[#allocation4] sm:$0x1] %v142_v44  ;;  %p229_p12 = pnand %p228_p11, %p222_p8 }
 0x221   :  { %232 = shalt.err (!%p229_p12)
}
 0x222   :  { %s233_s2 = scalar_lea.hbm %s304_s3, 16 }
 0x223   :  { %p234_p13 = scmp.ne.s32.totalorder %s304_s3, %s233_s2  ;;  %p237_p0 = scmp.lt.u32.totalorder %s233_s2, %s304_s3 }
 0x225   :  { %p239_p1 = pnand %p237_p0, %p234_p13 }
 0x227   :  { %242 = shalt.err (!%p239_p1)
}
 0x228   :  { %163 = dma.vmem_to_hbm [thread:$0]  %s161_s29, 16, %s304_s3, [#allocation5]  }
 0x229   :  { %243 = dma.done.wait [#allocation3], 16  }
 0x22a   :  { %244 = vsyncadd [#allocation3], 4294967280 }
 0x22b   :  { %245 = dma.done.wait [#allocation5], 16  }
 0x22c   :  { %246 = vsyncadd [#allocation5], 4294967280 }
 0x22d   :  { %170 = vsyncpa [#allocation3], 1 }
 0x22e   :  { %171 = vsyncpa [#allocation5], 1 }

</bundles_post_ra>
